<compile_context>
chip_gen: v5e
topology: v5e:2x2
jax: 0.10.0
libtpu: 0.0.40
codegen_flags: <defaults>
</compile_context>

<pallas_src>
import numpy as np

import jax
import jax.numpy as jnp
from jax.experimental import pallas as pl
from jax.experimental.pallas import tpu as pltpu


# ----------------------------------------------------------------------------
# Kernel
# ----------------------------------------------------------------------------
def _pcl_kernel(x_ref, y_ref, mask_ref, fh_ref, fw_ref, out_ref):
    # x_ref / y_ref: (1, Cblk, H, W) slabs of batch element 0.
    _, cb, H, W = x_ref.shape

    xb = x_ref[0].astype(jnp.float32)          # (Cblk, H, W)
    yb = y_ref[0].astype(jnp.float32)          # (Cblk, H, W)

    # Lane-dense image stack: [x_0 | x_1 | ... | y_0 | y_1 | ...]  -> (H, 2*Cblk*W)
    cols = [xb[c] for c in range(cb)] + [yb[c] for c in range(cb)]
    v = jnp.concatenate(cols, axis=1)
    cw = 2 * cb * W                            # fused lane width

    # Stage 1: row DFT of every image at once.  [Re(F_H); Im(F_H)] @ V
    ab = jnp.dot(fh_ref[...], v,
                 preferred_element_type=jnp.float32,
                 precision=jax.lax.Precision.HIGHEST)          # (2H, cw)

    # Stage 2: column DFT of every image at once via block-diagonal right
    # operand [blockdiag(Frw) | blockdiag(Fiw)].
    q = jnp.dot(ab, fw_ref[...],
                preferred_element_type=jnp.float32,
                precision=jax.lax.Precision.HIGHEST)           # (2H, 2*cw)

    # Recover real / imaginary parts per image (still lane-stacked):
    #   re = A@Frw - B@Fiw ,  im = A@Fiw + B@Frw
    re = q[:H, :cw] - q[H:, cw:]               # (H, cw)
    im = q[:H, cw:] + q[H:, :cw]               # (H, cw)

    # Masked log-amplitude.  mask_ref already holds 0.5 * ifftshift(mask),
    # tiled once per image block, so this is exactly mask * log|F|.
    amp = mask_ref[...] * jnp.log(re * re + im * im + 1e-30)   # (H, cw)

    half = cw // 2
    ax = amp[:, :half]                         # x channels of this block
    ay = amp[:, half:]                         # y channels of this block

    dot_xy = jnp.sum(ax * ay)
    nx = jnp.sum(ax * ax)
    ny = jnp.sum(ay * ay)

    # Emit the three partial sums as one full (8, 128) f32 vreg block
    # (lane-dense, unmasked store); final reduce + cosine happen in XLA.
    lane = jax.lax.broadcasted_iota(jnp.int32, (8, 128), 1)
    sub = jax.lax.broadcasted_iota(jnp.int32, (8, 128), 0)
    row0 = sub == 0
    out_ref[0] = jnp.where(row0 & (lane == 0), dot_xy,
                 jnp.where(row0 & (lane == 1), nx,
                 jnp.where(row0 & (lane == 2), ny, jnp.float32(0.0))))


# ----------------------------------------------------------------------------
# Host-side constants
# ----------------------------------------------------------------------------
def _dft_pair(n):
    """Real / imaginary parts of the n-point DFT matrix (float64 host math)."""
    k = np.arange(n)
    kk = np.mod(np.outer(k, k), n).astype(np.float64)
    theta = (-2.0 * np.pi / n) * kk
    return np.cos(theta), np.sin(theta)


def _build_constants(H, W, cb):
    # High-pass Gaussian mask, fftshift folded in (ifftshift of the mask),
    # and the 0.5 factor of log|F| folded in too.
    ci, cj = H // 2, W // 2
    ii = np.arange(H)[:, None]
    jj = np.arange(W)[None, :]
    d2 = (ii - ci) ** 2 + (jj - cj) ** 2
    mask = 1.0 - np.exp(-0.5 * d2 / 25.0)                      # radius = 5
    mask = np.roll(mask, (-ci, -cj), axis=(0, 1)) * 0.5
    mask_wide = np.tile(mask, (1, 2 * cb)).astype(np.float32)  # (H, 2*cb*W)

    frh, fih = _dft_pair(H)
    frw, fiw = _dft_pair(W)

    fh_stack = np.concatenate([frh, fih], axis=0).astype(np.float32)  # (2H, H)

    eye = np.eye(2 * cb)
    r_re = np.kron(eye, frw)                                   # per-image @ Frw
    r_im = np.kron(eye, fiw)                                   # per-image @ Fiw
    fw_stack = np.concatenate([r_re, r_im], axis=1).astype(np.float32)
    # fw_stack: (2*cb*W, 4*cb*W)

    return jnp.asarray(mask_wide), jnp.asarray(fh_stack), jnp.asarray(fw_stack)


def _pick_cblk(C, W):
    """Largest divisor of C such that the fused lane width 2*Cblk*W ~<= 256."""
    target = max(1, -(-256 // (2 * W)))        # ceil(256 / (2W))
    best = 1
    for d in range(1, C + 1):
        if C % d == 0 and d <= target:
            best = d
    return best


# ----------------------------------------------------------------------------
# Wrapper
# ----------------------------------------------------------------------------
def phase_consistency_loss(x, y):
    """x, y: (B, C, H, W) arrays (NCHW).  Returns a scalar float32 loss."""
    B, C, H, W = x.shape
    cb = _pick_cblk(C, W)
    G = C // cb
    lanes = 2 * cb * W

    mask_wide, fh_stack, fw_stack = _build_constants(H, W, cb)

    partials = pl.pallas_call(
        _pcl_kernel,
        out_shape=jax.ShapeDtypeStruct((G, 8, 128), jnp.float32),
        grid_spec=pltpu.PrefetchScalarGridSpec(
            num_scalar_prefetch=0,
            grid=(G,),
            in_specs=[
                # batch-0 slice + channel block taken straight from NCHW input
                pl.BlockSpec((1, cb, H, W), lambda g: (0, g, 0, 0)),   # x
                pl.BlockSpec((1, cb, H, W), lambda g: (0, g, 0, 0)),   # y
                pl.BlockSpec((H, lanes), lambda g: (0, 0)),            # mask (tiled)
                pl.BlockSpec((2 * H, H), lambda g: (0, 0)),            # [Frh; Fih]
                pl.BlockSpec((lanes, 2 * lanes), lambda g: (0, 0)),    # [bd(Frw)|bd(Fiw)]
            ],
            out_specs=pl.BlockSpec((1, 8, 128), lambda g: (g, 0, 0)),
        ),
        compiler_params=pltpu.CompilerParams(
            dimension_semantics=("parallel",)),
    )(x, y, mask_wide, fh_stack, fw_stack)

    dot_xy = jnp.sum(partials[:, 0, 0])
    nx = jnp.sum(partials[:, 0, 1])
    ny = jnp.sum(partials[:, 0, 2])

    # torch.cosine_similarity: dot / (max(||x||, eps) * max(||y||, eps)), eps=1e-8
    eps = jnp.float32(1e-8)
    denom = jnp.maximum(jnp.sqrt(nx), eps) * jnp.maximum(jnp.sqrt(ny), eps)
    return -(dot_xy / denom)


# ----------------------------------------------------------------------------
# Pure-JAX reference (mirrors the PyTorch forward) for the sanity check
# ----------------------------------------------------------------------------
def _reference_jax(x, y):
    x0 = x[0].astype(jnp.float32)
    y0 = y[0].astype(jnp.float32)
    _, H, W = x0.shape
    ci, cj = H // 2, W // 2
    i = jnp.arange(H, dtype=jnp.float32)[:, None]
    j = jnp.arange(W, dtype=jnp.float32)[None, :]
    m = 1.0 - jnp.exp(-0.5 * ((i - ci) ** 2 + (j - cj) ** 2) / 25.0)
    # torch.fft.fftshift default shifts ALL dims (incl. channels) — mirror it.
    amp_x = (m * jnp.log(jnp.abs(jnp.fft.fftshift(jnp.fft.fft2(x0))))).reshape(-1)
    amp_y = (m * jnp.log(jnp.abs(jnp.fft.fftshift(jnp.fft.fft2(y0))))).reshape(-1)
    eps = jnp.float32(1e-8)
    denom = (jnp.maximum(jnp.linalg.norm(amp_x), eps)
             * jnp.maximum(jnp.linalg.norm(amp_y), eps))
    return -(jnp.dot(amp_x, amp_y) / denom)


if __name__ == "__main__":
    key = jax.random.PRNGKey(0)
    kx, ky = jax.random.split(key)
    B, C, H, W = 2, 4, 16, 16
    x = jax.random.uniform(kx, (B, C, H, W), dtype=jnp.float32) + 0.1
    y = jax.random.uniform(ky, (B, C, H, W), dtype=jnp.float32) + 0.1

    loss = jax.block_until_ready(phase_consistency_loss(x, y))
    ref = jax.block_until_ready(_reference_jax(x, y))
    assert jnp.isfinite(loss), "kernel produced non-finite loss"
    assert abs(float(loss) - float(ref)) < 2e-2, (float(loss), float(ref))
    print("KERNEL_OK")
</pallas_src>

<mosaic_0001>
module attributes {stable_mosaic.version = 11 : i64} {
  func.func @_pcl_kernel(%arg0: i32, %arg1: memref<1x4x16x16xf32, #tpu.memory_space<vmem>>, %arg2: memref<1x4x16x16xf32, #tpu.memory_space<vmem>>, %arg3: memref<16x128xf32, #tpu.memory_space<vmem>>, %arg4: memref<32x16xf32, #tpu.memory_space<vmem>>, %arg5: memref<128x256xf32, #tpu.memory_space<vmem>>, %arg6: memref<1x8x128xf32, #tpu.memory_space<vmem>>) attributes {dimension_semantics = [#tpu.dimension_semantics<parallel>], iteration_bounds = array<i64: 1>, scalar_prefetch = 0 : i64, scratch_operands = 0 : i64, tpu.core_type = #tpu.core_type<tc>, window_params = [{transform_indices = @transform_0, window_bounds = array<i64: 1, 4, 16, 16>}, {transform_indices = @transform_1, window_bounds = array<i64: 1, 4, 16, 16>}, {pipeline_mode = #tpu.pipeline_mode<synchronous>, transform_indices = @transform_2, window_bounds = array<i64: 16, 128>}, {pipeline_mode = #tpu.pipeline_mode<synchronous>, transform_indices = @transform_3, window_bounds = array<i64: 32, 16>}, {pipeline_mode = #tpu.pipeline_mode<synchronous>, transform_indices = @transform_4, window_bounds = array<i64: 128, 256>}, {transform_indices = @transform_5, window_bounds = array<i64: 1, 8, 128>}]} {
    %c0 = arith.constant 0 : index
    %c0_0 = arith.constant 0 : index
    %c0_1 = arith.constant 0 : index
    %c0_2 = arith.constant 0 : index
    %0 = vector.load %arg1[%c0, %c0_0, %c0_1, %c0_2] : memref<1x4x16x16xf32, #tpu.memory_space<vmem>>, vector<1x4x16x16xf32>
    %1 = vector.shape_cast %0 : vector<1x4x16x16xf32> to vector<4x16x16xf32>
    %c0_3 = arith.constant 0 : index
    %c0_4 = arith.constant 0 : index
    %c0_5 = arith.constant 0 : index
    %c0_6 = arith.constant 0 : index
    %2 = vector.load %arg2[%c0_3, %c0_4, %c0_5, %c0_6] : memref<1x4x16x16xf32, #tpu.memory_space<vmem>>, vector<1x4x16x16xf32>
    %3 = vector.shape_cast %2 : vector<1x4x16x16xf32> to vector<4x16x16xf32>
    %4 = vector.extract_strided_slice %1 {offsets = [0, 0, 0], sizes = [1, 16, 16], strides = [1, 1, 1]} : vector<4x16x16xf32> to vector<1x16x16xf32>
    %5 = vector.shape_cast %4 : vector<1x16x16xf32> to vector<16x16xf32>
    %6 = vector.extract_strided_slice %1 {offsets = [1, 0, 0], sizes = [1, 16, 16], strides = [1, 1, 1]} : vector<4x16x16xf32> to vector<1x16x16xf32>
    %7 = vector.shape_cast %6 : vector<1x16x16xf32> to vector<16x16xf32>
    %8 = vector.extract_strided_slice %1 {offsets = [2, 0, 0], sizes = [1, 16, 16], strides = [1, 1, 1]} : vector<4x16x16xf32> to vector<1x16x16xf32>
    %9 = vector.shape_cast %8 : vector<1x16x16xf32> to vector<16x16xf32>
    %10 = vector.extract_strided_slice %1 {offsets = [3, 0, 0], sizes = [1, 16, 16], strides = [1, 1, 1]} : vector<4x16x16xf32> to vector<1x16x16xf32>
    %11 = vector.shape_cast %10 : vector<1x16x16xf32> to vector<16x16xf32>
    %12 = vector.extract_strided_slice %3 {offsets = [0, 0, 0], sizes = [1, 16, 16], strides = [1, 1, 1]} : vector<4x16x16xf32> to vector<1x16x16xf32>
    %13 = vector.shape_cast %12 : vector<1x16x16xf32> to vector<16x16xf32>
    %14 = vector.extract_strided_slice %3 {offsets = [1, 0, 0], sizes = [1, 16, 16], strides = [1, 1, 1]} : vector<4x16x16xf32> to vector<1x16x16xf32>
    %15 = vector.shape_cast %14 : vector<1x16x16xf32> to vector<16x16xf32>
    %16 = vector.extract_strided_slice %3 {offsets = [2, 0, 0], sizes = [1, 16, 16], strides = [1, 1, 1]} : vector<4x16x16xf32> to vector<1x16x16xf32>
    %17 = vector.shape_cast %16 : vector<1x16x16xf32> to vector<16x16xf32>
    %18 = vector.extract_strided_slice %3 {offsets = [3, 0, 0], sizes = [1, 16, 16], strides = [1, 1, 1]} : vector<4x16x16xf32> to vector<1x16x16xf32>
    %19 = vector.shape_cast %18 : vector<1x16x16xf32> to vector<16x16xf32>
    %20 = tpu.concatenate %5, %7, %9, %11, %13, %15, %17, %19 in 1 : vector<16x16xf32>, vector<16x16xf32>, vector<16x16xf32>, vector<16x16xf32>, vector<16x16xf32>, vector<16x16xf32>, vector<16x16xf32>, vector<16x16xf32> -> vector<16x128xf32>
    %c0_7 = arith.constant 0 : index
    %c0_8 = arith.constant 0 : index
    %21 = vector.load %arg4[%c0_7, %c0_8] : memref<32x16xf32, #tpu.memory_space<vmem>>, vector<32x16xf32>
    %cst = arith.constant dense<0.000000e+00> : vector<32x128xf32>
    %22 = tpu.matmul %21, %20, %cst {dimension_numbers = #tpu.dot_dimension_numbers<[1], [0], [0], [1], [0, 0, 1, 1], [], []>, precision = #tpu.contract_precision<fp32>} : vector<32x16xf32>, vector<16x128xf32>, vector<32x128xf32> -> vector<32x128xf32>
    %c0_9 = arith.constant 0 : index
    %c0_10 = arith.constant 0 : index
    %23 = vector.load %arg5[%c0_9, %c0_10] : memref<128x256xf32, #tpu.memory_space<vmem>>, vector<128x256xf32>
    %cst_11 = arith.constant dense<0.000000e+00> : vector<32x256xf32>
    %24 = tpu.matmul %22, %23, %cst_11 {dimension_numbers = #tpu.dot_dimension_numbers<[1], [0], [0], [1], [0, 0, 1, 1], [], []>, precision = #tpu.contract_precision<fp32>} : vector<32x128xf32>, vector<128x256xf32>, vector<32x256xf32> -> vector<32x256xf32>
    %25 = vector.extract_strided_slice %24 {offsets = [0, 0], sizes = [16, 128], strides = [1, 1]} : vector<32x256xf32> to vector<16x128xf32>
    %26 = vector.extract_strided_slice %24 {offsets = [16, 128], sizes = [16, 128], strides = [1, 1]} : vector<32x256xf32> to vector<16x128xf32>
    %27 = arith.subf %25, %26 : vector<16x128xf32>
    %28 = vector.extract_strided_slice %24 {offsets = [0, 128], sizes = [16, 128], strides = [1, 1]} : vector<32x256xf32> to vector<16x128xf32>
    %29 = vector.extract_strided_slice %24 {offsets = [16, 0], sizes = [16, 128], strides = [1, 1]} : vector<32x256xf32> to vector<16x128xf32>
    %30 = arith.addf %28, %29 : vector<16x128xf32>
    %c0_12 = arith.constant 0 : index
    %c0_13 = arith.constant 0 : index
    %31 = vector.load %arg3[%c0_12, %c0_13] : memref<16x128xf32, #tpu.memory_space<vmem>>, vector<16x128xf32>
    %32 = arith.mulf %27, %27 : vector<16x128xf32>
    %33 = arith.mulf %30, %30 : vector<16x128xf32>
    %34 = arith.addf %32, %33 : vector<16x128xf32>
    %cst_14 = arith.constant 1.000000e-30 : f32
    %35 = vector.broadcast %cst_14 : f32 to vector<16x128xf32>
    %36 = arith.addf %34, %35 : vector<16x128xf32>
    %37 = math.log %36 : vector<16x128xf32>
    %38 = arith.mulf %31, %37 : vector<16x128xf32>
    %39 = vector.extract_strided_slice %38 {offsets = [0, 0], sizes = [16, 64], strides = [1, 1]} : vector<16x128xf32> to vector<16x64xf32>
    %40 = vector.extract_strided_slice %38 {offsets = [0, 64], sizes = [16, 64], strides = [1, 1]} : vector<16x128xf32> to vector<16x64xf32>
    %41 = arith.mulf %39, %40 : vector<16x64xf32>
    %42 = vector.shape_cast %41 : vector<16x64xf32> to vector<1x16x64xf32>
    %cst_15 = arith.constant dense<0.000000e+00> : vector<1xf32>
    %43 = vector.multi_reduction <add>, %42, %cst_15 [1, 2] : vector<1x16x64xf32> to vector<1xf32>
    %44 = vector.shape_cast %43 : vector<1xf32> to vector<1x1x1xf32>
    %45 = vector.extract %44[0, 0, 0] : f32 from vector<1x1x1xf32>
    %46 = arith.mulf %39, %39 : vector<16x64xf32>
    %47 = vector.shape_cast %46 : vector<16x64xf32> to vector<1x16x64xf32>
    %cst_16 = arith.constant dense<0.000000e+00> : vector<1xf32>
    %48 = vector.multi_reduction <add>, %47, %cst_16 [1, 2] : vector<1x16x64xf32> to vector<1xf32>
    %49 = vector.shape_cast %48 : vector<1xf32> to vector<1x1x1xf32>
    %50 = vector.extract %49[0, 0, 0] : f32 from vector<1x1x1xf32>
    %51 = arith.mulf %40, %40 : vector<16x64xf32>
    %52 = vector.shape_cast %51 : vector<16x64xf32> to vector<1x16x64xf32>
    %cst_17 = arith.constant dense<0.000000e+00> : vector<1xf32>
    %53 = vector.multi_reduction <add>, %52, %cst_17 [1, 2] : vector<1x16x64xf32> to vector<1xf32>
    %54 = vector.shape_cast %53 : vector<1xf32> to vector<1x1x1xf32>
    %55 = vector.extract %54[0, 0, 0] : f32 from vector<1x1x1xf32>
    %56 = tpu.iota {dimensions = array<i32: 1>} : vector<8x128xi32>
    %57 = tpu.iota {dimensions = array<i32: 0>} : vector<8x128xi32>
    %c0_i32 = arith.constant 0 : i32
    %58 = vector.broadcast %c0_i32 : i32 to vector<8x128xi32>
    %59 = arith.cmpi eq, %57, %58 : vector<8x128xi32>
    %c0_i32_18 = arith.constant 0 : i32
    %60 = vector.broadcast %c0_i32_18 : i32 to vector<8x128xi32>
    %61 = arith.cmpi eq, %56, %60 : vector<8x128xi32>
    %62 = arith.andi %59, %61 : vector<8x128xi1>
    %c1_i32 = arith.constant 1 : i32
    %63 = vector.broadcast %c1_i32 : i32 to vector<8x128xi32>
    %64 = arith.cmpi eq, %56, %63 : vector<8x128xi32>
    %65 = arith.andi %59, %64 : vector<8x128xi1>
    %c2_i32 = arith.constant 2 : i32
    %66 = vector.broadcast %c2_i32 : i32 to vector<8x128xi32>
    %67 = arith.cmpi eq, %56, %66 : vector<8x128xi32>
    %68 = arith.andi %59, %67 : vector<8x128xi1>
    %cst_19 = arith.constant 0.000000e+00 : f32
    %69 = vector.broadcast %55 : f32 to vector<8x128xf32>
    %70 = vector.broadcast %cst_19 : f32 to vector<8x128xf32>
    %71 = arith.select %68, %69, %70 : vector<8x128xi1>, vector<8x128xf32>
    %72 = vector.broadcast %50 : f32 to vector<8x128xf32>
    %73 = arith.select %65, %72, %71 : vector<8x128xi1>, vector<8x128xf32>
    %74 = vector.broadcast %45 : f32 to vector<8x128xf32>
    %75 = arith.select %62, %74, %73 : vector<8x128xi1>, vector<8x128xf32>
    %c0_20 = arith.constant 0 : index
    %c0_21 = arith.constant 0 : index
    %c0_22 = arith.constant 0 : index
    %76 = vector.load %arg6[%c0_20, %c0_21, %c0_22] : memref<1x8x128xf32, #tpu.memory_space<vmem>>, vector<1x8x128xf32>
    %77 = vector.shape_cast %76 : vector<1x8x128xf32> to vector<8x128xf32>
    %78 = vector.shape_cast %75 : vector<8x128xf32> to vector<1x8x128xf32>
    tpu.vector_store %arg6[%c0_20, %c0_21, %c0_22], %78 {strides = array<i32>} : memref<1x8x128xf32, #tpu.memory_space<vmem>>, vector<1x8x128xf32>,
    return
  }
  func.func @transform_0(%arg0: i32) -> (i32, i32, i32, i32) {
    %c0_i32 = arith.constant 0 : i32
    %c0_i32_0 = arith.constant 0 : i32
    %c0_i32_1 = arith.constant 0 : i32
    %c0_i32_2 = arith.constant 0 : i32
    return %c0_i32, %arg0, %c0_i32_0, %c0_i32_1 : i32, i32, i32, i32
  }
  func.func @transform_1(%arg0: i32) -> (i32, i32, i32, i32) {
    %c0_i32 = arith.constant 0 : i32
    %c0_i32_0 = arith.constant 0 : i32
    %c0_i32_1 = arith.constant 0 : i32
    %c0_i32_2 = arith.constant 0 : i32
    return %c0_i32, %arg0, %c0_i32_0, %c0_i32_1 : i32, i32, i32, i32
  }
  func.func @transform_2(%arg0: i32) -> (i32, i32) {
    %c0_i32 = arith.constant 0 : i32
    %c0_i32_0 = arith.constant 0 : i32
    %c0_i32_1 = arith.constant 0 : i32
    return %c0_i32, %c0_i32_0 : i32, i32
  }
  func.func @transform_3(%arg0: i32) -> (i32, i32) {
    %c0_i32 = arith.constant 0 : i32
    %c0_i32_0 = arith.constant 0 : i32
    %c0_i32_1 = arith.constant 0 : i32
    return %c0_i32, %c0_i32_0 : i32, i32
  }
  func.func @transform_4(%arg0: i32) -> (i32, i32) {
    %c0_i32 = arith.constant 0 : i32
    %c0_i32_0 = arith.constant 0 : i32
    %c0_i32_1 = arith.constant 0 : i32
    return %c0_i32, %c0_i32_0 : i32, i32
  }
  func.func @transform_5(%arg0: i32) -> (i32, i32, i32) {
    %c0_i32 = arith.constant 0 : i32
    %c0_i32_0 = arith.constant 0 : i32
    %c0_i32_1 = arith.constant 0 : i32
    return %arg0, %c0_i32, %c0_i32_0 : i32, i32, i32
  }
}

</mosaic_0001>

<bundles_post_ra>
// kernel: tpu_custom_call.1
= control target key start
LH: loop header
LB: loop body
LE: loop exit
PB: predicated region body
PF: predicated region fallthrough
CT: control target
= control target key end

     0   :  { %10 = vsyncpa [#allocation3], 0  ;;  %s2305_s0 = inlined_call_operand.hbm [shape: f32[2,4,16,16], index: 0, kind: input, shape index: {}]   ;;  %s2306_s1 = inlined_call_operand.hbm [shape: f32[2,4,16,16], index: 1, kind: input, shape index: {}]   ;;  %s2307_s2 = inlined_call_operand.vmem [shape: f32[16,128], index: 2, kind: input, shape index: {}]   ;;  %s2308_s3 = inlined_call_operand.vmem [shape: f32[32,16], index: 3, kind: input, shape index: {}]   ;;  %s2309_s4 = inlined_call_operand.hbm [shape: f32[128,256], index: 4, kind: input, shape index: {}]   ;;  %s2310_s5 = inlined_call_operand.hbm [shape: f32[1,8,128], index: 5, kind: output, shape index: {}]  }
   0x1   :  { %11 = vsyncpa [#allocation6], 0 }
   0x2   :  { %12 = vsyncpa [#allocation4], 0  ;;  %s30_s20 = sshll.u32 %s2306_s1, 4  ;;  %s1571_s21 = smov [#allocation5]   ;;  %s31_s20 = int_to_ptr.hbm [resolvable:$true] %s30_s20 }
   0x3   :  { %s32_s22 = sshll.u32 %s1571_s21, 4  ;;  %s17_s25 = sshll.u32 %s2305_s0, 4  ;;  %s33_s22 = int_to_ptr.vmem [resolvable:$true] %s32_s22  ;;  %s18_s25 = int_to_ptr.hbm [resolvable:$true] %s17_s25 }
   0x4   :  { %s1572_s26 = smov 128   ;;  %s1573_s27 = smov 8  }
   0x5   :  { %38 = dma.hbm_to_vmem [thread:$0]  %s31_s20, 1024, %s33_s22, [#allocation6], %s1572_s26, %s1572_s26, %s1573_s27  }
   0x6   :  { %s1574_s28 = smov [#allocation2]   ;;  %s47_s7 = sshll.u32 %s2309_s4, 4  ;;  %s48_s7 = int_to_ptr.hbm [resolvable:$true] %s47_s7 }
   0x7   :  { %s19_s29 = sshll.u32 %s1574_s28, 4  ;;  %s1575_s1 = smov [#allocation7]   ;;  %s20_s29 = int_to_ptr.vmem [resolvable:$true] %s19_s29 }
   0x8   :  { %25 = dma.hbm_to_vmem [thread:$0]  %s18_s25, 1024, %s20_s29, [#allocation3], %s1572_s26, %s1572_s26, %s1573_s27  }
   0x9   :  { %s49_s8 = sshll.u32 %s1575_s1, 4  ;;  %s1576_s9 = smov 256   ;;  %s50_s8 = int_to_ptr.vmem [resolvable:$true] %s49_s8 }
   0xa   :  { %s1577_s10 = smov 16  }
   0xb   :  { %55 = dma.hbm_to_vmem [thread:$0]  %s48_s7, 4096, %s50_s8, [#allocation6], %s1576_s9, %s1576_s9, %s1577_s10  }
   0xc   :  { %1565 = dma.done.wait [#allocation3], 1024  }
   0xd   :  { %1566 = vsyncadd [#allocation3], 4294966272 }
   0xe   :  { %1567 = dma.done.wait [#allocation6], 5120  }
   0xf   :  { %1568 = vsyncadd [#allocation6], 4294962176  ;;  %v71_v0 = vld [vmem:[#allocation2 + $0x18] sm:$0xff]  ;;  %v70_v1 = vld [vmem:[#allocation2 + $0x10] sm:$0xff]  ;;  %s1578_s0 = smov 32   ;;  %s1579_s4 = smov 48  }
  0x10   :  { %88 = vrot.lane.b32.xlu0 %v71_v0, %s1577_s10  ;;  %86 = vrot.lane.b32.xlu1 %v70_v1, %s1577_s10  ;;  %v72_v2 = vld [vmem:[#allocation2 + $0x20] sm:$0xff]  ;;  %v73_v3 = vld [vmem:[#allocation2 + $0x28] sm:$0xff]  ;;  %v75_v4 = vld [vmem:[#allocation2 + $0x38] sm:$0xff]  ;;  %s1580_s11 = smov 64   ;;  %s1581_s12 = smov 80   ;;  %vm140_vm0 = vcmask 130048  }
  0x11   :  { %94 = vrot.lane.b32.xlu2 %v72_v2, %s1578_s0  ;;  %v77_v5 = vld [vmem:[#allocation5 + $0x8] sm:$0xff]  ;;  %v74_v6 = vld [vmem:[#allocation2 + $0x30] sm:$0xff]  ;;  %v79_v7 = vld [vmem:[#allocation5 + $0x18] sm:$0xff]  ;;  %s1582_s13 = smov 96   ;;  %s1583_s14 = smov 112   ;;  %vm143_vm1 = vcmask 261120  }
  0x12   :  { %v76_v8 = vld [vmem:[#allocation5] sm:$0xff]  ;;  %v81_v9 = vld [vmem:[#allocation5 + $0x28] sm:$0xff]  ;;  %v78_v10 = vld [vmem:[#allocation5 + $0x10] sm:$0xff]  ;;  %vm146_vm2 = vcmask 392192   ;;  %vm149_vm3 = vcmask 523264   ;;  %vm152_vm4 = vcmask 654336  }
  0x13   :  { %v83_v11 = vld [vmem:[#allocation5 + $0x38] sm:$0xff]  ;;  %v80_v12 = vld [vmem:[#allocation5 + $0x20] sm:$0xff]  ;;  %v82_v13 = vld [vmem:[#allocation5 + $0x30] sm:$0xff]  ;;  %vm155_vm5 = vcmask 785408   ;;  %vm158_vm6 = vcmask 916480   ;;  %s1584_s27 = smov [#allocation8]  }
  0x14   :  { %v69_v20 = vld [vmem:[#allocation2 + $0x8] sm:$0xff]  ;;  %v163_v22 = vld [vmem:[%s2308_s3 + $0x10] sm:$0xff]  ;;  %v161_v23 = vld [vmem:[%s2308_s3] sm:$0xff]  ;;  %s1428_s28 = sshll.u32 %s1584_s27, 4  ;;  %s1430_s7 = sshll.u32 %s2310_s5, 4  ;;  %s1429_s28 = int_to_ptr.vmem [resolvable:$true] %s1428_s28  ;;  %s1431_s7 = int_to_ptr.hbm [resolvable:$true] %s1430_s7 }
  0x15   :  { %v172_v27 = vsel %vm140_vm0, %v163_v22, 0  ;;  %v166_v29 = vsel %vm140_vm0, %v161_v23, 0  ;;  %v68_v33 = vld [vmem:[#allocation2] sm:$0xff]  ;;  %v164_v34 = vld [vmem:[%s2308_s3 + $0x18] sm:$0xff]  ;;  %v162_v35 = vld [vmem:[%s2308_s3 + $0x8] sm:$0xff] }
  0x16   :  { %v1636_v30 = vand.u32 4294901760, %v172_v27  ;;  %v1639_v32 = vand.u32 4294901760, %v166_v29  ;;  %v175_v43 = vsel %vm140_vm0, %v164_v34, 0  ;;  %v169_v46 = vsel %vm140_vm0, %v162_v35, 0  ;;  %v455_v23 = vld [vmem:[#allocation7 + $0xd0] sm:$0xff] }
  0x17   :  { %v1662_v51 = vand.u32 4294901760, %v175_v43  ;;  %v203_v54 = vand.u32 4294901760, %v169_v46 }
  0x18   :  { %96 = vrot.lane.b32.xlu0 %v73_v3, %s1578_s0  ;;  %104 = vrot.lane.b32.xlu1 %v75_v4, %s1579_s4  ;;  %v1649_v38 = vsub.f32 %v172_v27, %v1636_v30  ;;  %v1655_v44 = vsub.f32 %v166_v29, %v1639_v32  ;;  %v453_v27 = vld [vmem:[#allocation7 + $0xc0] sm:$0xff] }
  0x19   :  { %112 = vrot.lane.b32.xlu2 %v77_v5, %s1580_s11  ;;  %v220_v59 = vsub.f32 %v175_v43, %v1662_v51  ;;  %v204_v0 = vsub.f32 %v169_v46, %v203_v54 }
  0x1a   :  { %v213_v50 = vand.u32 4294901760, %v1649_v38  ;;  %v197_v53 = vand.u32 4294901760, %v1655_v44 }
  0x1c   :  { %v214_v58 = vsub.f32 %v1649_v38, %v213_v50  ;;  %v198_v63 = vsub.f32 %v1655_v44, %v197_v53 }
  0x20   :  { %102 = vrot.lane.b32.xlu0 %v74_v6, %s1579_s4  ;;  %120 = vrot.lane.b32.xlu1 %v79_v7, %s1581_s12  ;;  %v215_v6 = vand.u32 4294901760, %v214_v58  ;;  %v221_v7 = vand.u32 4294901760, %v220_v59 }
  0x21   :  { %110 = vrot.lane.b32.xlu2 %v76_v8, %s1580_s11  ;;  %v199_v8 = vand.u32 4294901760, %v198_v63 }
  0x28   :  { %128 = vrot.lane.b32.xlu0 %v81_v9, %s1582_s13  ;;  %118 = vrot.lane.b32.xlu1 %v78_v10, %s1581_s12  ;;  %v205_v9 = vand.u32 4294901760, %v204_v0 }
  0x29   :  { %136 = vrot.lane.b32.xlu2 %v83_v11, %s1583_s14 }
  0x30   :  { %126 = vrot.lane.b32.xlu0 %v80_v12, %s1582_s13  ;;  %134 = vrot.lane.b32.xlu1 %v82_v13, %s1583_s14  ;;  %v222_v12 = vsub.f32 %v220_v59, %v221_v7  ;;  %v206_v13 = vsub.f32 %v204_v0, %v205_v9 }
  0x6b   :  { %v95_v14 = vpop.permute.xlu2 %94 }
  0x73   :  { %v113_v17 = vpop.permute.xlu2 %112 }
  0x7b   :  { %v111_v21 = vpop.permute.xlu2 %110 }
  0x82   :  { %v89_v15 = vpop.permute.xlu0 %88  ;;  %v87_v16 = vpop.permute.xlu1 %86 }
  0x83   :  { %v142_v24 = vsel %vm140_vm0, %v69_v20, %v89_v15  ;;  %v137_v37 = vpop.permute.xlu2 %136  ;;  %v141_v39 = vsel %vm140_vm0, %v68_v33, %v87_v16  ;;  %v223_v16 = vand.u32 4294901760, %v222_v12  ;;  %v457_v20 = vld [vmem:[#allocation7 + $0xe0] sm:$0xff] }
  0x84   :  { %v144_v48 = vsel %vm143_vm1, %v141_v39, %v95_v14  ;;  %v1693_v22 = vand.u32 4294901760, %v457_v20 }
  0x8a   :  { %v97_v18 = vpop.permute.xlu0 %96  ;;  %v105_v19 = vpop.permute.xlu1 %104 }
  0x8b   :  { %v145_v28 = vsel %vm143_vm1, %v142_v24, %v97_v18  ;;  %v459_v18 = vld [vmem:[#allocation7 + $0xf0] sm:$0xff] }
  0x8c   :  { %v148_v31 = vsel %vm146_vm2, %v145_v28, %v105_v19  ;;  %v1688_v19 = vand.u32 4294901760, %v459_v18 }
  0x8d   :  { %v151_v36 = vsel %vm149_vm3, %v148_v31, %v113_v17  ;;  %v207_v17 = vand.u32 4294901760, %v206_v13  ;;  %v1714_v31 = vand.u32 4294901760, %v453_v27 }
  0x92   :  { %v103_v25 = vpop.permute.xlu0 %102  ;;  %v121_v26 = vpop.permute.xlu1 %120 }
  0x93   :  { %v154_v40 = vsel %vm152_vm4, %v151_v36, %v121_v26  ;;  %v147_v52 = vsel %vm146_vm2, %v144_v48, %v103_v25  ;;  %v1699_v25 = vsub.f32 %v457_v20, %v1693_v22  ;;  %v1702_v26 = vand.u32 4294901760, %v455_v23 }
  0x94   :  { %v150_v56 = vsel %vm149_vm3, %v147_v52, %v111_v21  ;;  %v1691_v21 = vsub.f32 %v459_v18, %v1688_v19  ;;  %v1723_v36 = vsub.f32 %v453_v27, %v1714_v31 }
  0x95   :  { %v534_v29 = vand.u32 4294901760, %v1699_v25 }
  0x96   :  { %v528_v24 = vand.u32 4294901760, %v1691_v21 }
  0x97   :  { %v535_v34 = vsub.f32 %v1699_v25, %v534_v29 }
  0x98   :  { %v529_v28 = vsub.f32 %v1691_v21, %v528_v24 }
  0x99   :  { %v536_v39 = vand.u32 4294901760, %v535_v34 }
  0x9a   :  { %v129_v41 = vpop.permute.xlu0 %128  ;;  %v119_v42 = vpop.permute.xlu1 %118  ;;  %v530_v33 = vand.u32 4294901760, %v529_v28  ;;  %v433_v28 = vld [vmem:[#allocation7 + $0x20] sm:$0xff] }
  0x9b   :  { %v157_v45 = vsel %vm155_vm5, %v154_v40, %v129_v41  ;;  %v153_v60 = vsel %vm152_vm4, %v150_v56, %v119_v42  ;;  %v546_v41 = vand.u32 4294901760, %v1723_v36  ;;  %v443_v56 = vld [vmem:[#allocation7 + $0x70] sm:$0xff] }
  0x9c   :  { %v160_v47 = vsel %vm158_vm6, %v157_v45, %v137_v37 }
  0x9d   :  { %v191_v49 = vand.u32 4294901760, %v160_v47  ;;  %v547_v46 = vsub.f32 %v1723_v36, %v546_v41 }
  0x9f   :  { %v243_v55 = vsub.f32 %v160_v47, %v191_v49  ;;  %192 = vmatpush.msra.mxu0 %v191_v49  ;;  %1441 = vmatpush.msra.mxu2 %v191_v49 }
  0xa1   :  { %v244_v57 = vand.u32 4294901760, %v243_v55 }
  0xa2   :  { %v127_v61 = vpop.permute.xlu0 %126  ;;  %v135_v62 = vpop.permute.xlu1 %134 }
  0xa3   :  { %v156_v1 = vsel %vm155_vm5, %v153_v60, %v127_v61  ;;  %v245_v2 = vsub.f32 %v243_v55, %v244_v57  ;;  %v1772_v60 = vand.u32 4294901760, %v443_v56 }
  0xa4   :  { %v159_v3 = vsel %vm158_vm6, %v156_v1, %v135_v62  ;;  %v441_v62 = vld [vmem:[#allocation7 + $0x60] sm:$0xff] }
  0xa5   :  { %v193_v4 = vand.u32 4294901760, %v159_v3  ;;  %v246_v5 = vand.u32 4294901760, %v245_v2  ;;  %v1782_v2 = vsub.f32 %v443_v56, %v1772_v60 }
  0xa7   :  { %v249_v10 = vsub.f32 %v159_v3, %v193_v4  ;;  %194 = vmatpush.msra.mxu0 %v193_v4  ;;  %1442 = vmatpush.msra.mxu2 %v193_v4  ;;  %v1786_v3 = vand.u32 4294901760, %v441_v62 }
  0xa8   :  { %247 = vmatpush.msra.mxu1 %v246_v5  ;;  %1443 = vmatpush.msra.mxu3 %v246_v5 }
  0xa9   :  { %216 = vmatmul.f32.vlgmr.msra.gmra.mxu2 %v215_v6  ;;  %372 = vmatpush.msrb.mxu0 %v244_v57  ;;  %v250_v11 = vand.u32 4294901760, %v249_v10 }
  0xaa   :  { %287 = vmatpush.msrb.mxu2 %v243_v55  ;;  %200 = vmatmul.f32.vlgmr.msra.gmra.mxu0 %v199_v8 }
  0xab   :  { %376 = vmatpush.msrb.mxu0 %v250_v11  ;;  %v251_v14 = vsub.f32 %v249_v10, %v250_v11 }
  0xac   :  { %290 = vmatpush.msrb.mxu2 %v249_v10  ;;  %v437_v10 = vld [vmem:[#allocation7 + $0x40] sm:$0xff] }
  0xad   :  { %v252_v15 = vand.u32 4294901760, %v251_v14  ;;  %641 = vmatpush.msra.mxu0 %v1691_v21  ;;  %v1806_v14 = vand.u32 4294901760, %v437_v10 }
  0xae   :  { %462 = vmatpush.msra.mxu2 %v1688_v19 }
  0xaf   :  { %253 = vmatpush.msra.mxu1 %v252_v15  ;;  %1444 = vmatpush.msra.mxu3 %v252_v15  ;;  %v1814_v20 = vsub.f32 %v437_v10, %v1806_v14 }
  0xb0   :  { %263 = vmatmul.f32.vlgmr.msra.gmra.mxu3 %v1636_v30  ;;  %255 = vmatmul.f32.vlgmr.msra.gmra.mxu1 %v1639_v32 }
  0xb1   :  { %409 = vmatpush.msrb.mxu1 %v191_v49  ;;  %224 = vmatmul.f32.gmra.mxu2 %v223_v16  ;;  %v435_v16 = vld [vmem:[#allocation7 + $0x30] sm:$0xff] }
  0xb2   :  { %327 = vmatpush.msrb.mxu3 %v191_v49  ;;  %208 = vmatmul.f32.gmra.mxu0 %v207_v17 }
  0xb3   :  { %411 = vmatpush.msrb.mxu1 %v193_v4  ;;  %464 = vmatpush.msra.mxu2 %v1693_v22 }
  0xb4   :  { %329 = vmatpush.msrb.mxu3 %v193_v4  ;;  %644 = vmatpush.msra.mxu0 %v1699_v25  ;;  %v439_v4 = vld [vmem:[#allocation7 + $0x50] sm:$0xff] }
  0xb5   :  { %709 = vmatpush.msra.mxu1 %v1688_v19  ;;  %466 = vmatpush.msra.mxu2 %v1702_v26  ;;  %v1792_v8 = vand.u32 4294901760, %v439_v4 }
  0xb6   :  { %531 = vmatpush.msra.mxu3 %v530_v33  ;;  %v594_v33 = vand.u32 4294901760, %v1814_v20 }
  0xb7   :  { %711 = vmatpush.msra.mxu1 %v1693_v22  ;;  %468 = vmatpush.msra.mxu2 %v1714_v31  ;;  %v1804_v13 = vsub.f32 %v439_v4, %v1792_v8 }
  0xb8   :  { %267 = vmatmul.f32.gmra.mxu3 %v1662_v51  ;;  %259 = vmatmul.f32.gmra.mxu1 %v203_v54 }
  0xb9   :  { %293 = vmatmul.f32.vlgmr.msrb.gmra.mxu2 %v1655_v44  ;;  %713 = vmatpush.msra.mxu1 %v1702_v26  ;;  %v447_v44 = vld [vmem:[#allocation7 + $0x90] sm:$0xff]  ;;  %v588_v18 = vand.u32 4294901760, %v1804_v13 }
  0xba   :  { %378 = vmatmul.f32.vlgmr.msrb.gmra.mxu0 %v1639_v32  ;;  %537 = vmatpush.msra.mxu3 %v536_v39  ;;  %v1748_v48 = vand.u32 4294901760, %v447_v44 }
  0xbb   :  { %715 = vmatpush.msra.mxu1 %v1714_v31 }
  0xc0   :  { %333 = vmatmul.f32.vlgmr.msrb.gmra.mxu3 %v197_v53  ;;  %413 = vmatmul.f32.vlgmr.msrb.gmra.mxu1 %v1639_v32  ;;  %v451_v32 = vld [vmem:[#allocation7 + $0xb0] sm:$0xff]  ;;  %v1755_v53 = vsub.f32 %v447_v44, %v1748_v48 }
  0xc1   :  { %298 = vmatmul.f32.gmra.mxu2 %v204_v0  ;;  %v1727_v37 = vand.u32 4294901760, %v451_v32 }
  0xc2   :  { %382 = vmatmul.f32.gmra.mxu0 %v203_v54  ;;  %v564_v58 = vand.u32 4294901760, %v1755_v53 }
  0xc3   :  { %v1738_v43 = vsub.f32 %v451_v32, %v1727_v37  ;;  %717 = vmatpush.msra.mxu1 %v1727_v37  ;;  %470 = vmatpush.msra.mxu2 %v1727_v37  ;;  %v589_v32 = vsub.f32 %v1804_v13, %v588_v18 }
  0xc4   :  { %v565_v0 = vsub.f32 %v1755_v53, %v564_v58 }
  0xc5   :  { %v552_v49 = vand.u32 4294901760, %v1738_v43  ;;  %v590_v44 = vand.u32 4294901760, %v589_v32 }
  0xc6   :  { %v566_v5 = vand.u32 4294901760, %v565_v0 }
  0xc7   :  { %v553_v55 = vsub.f32 %v1738_v43, %v552_v49 }
  0xc8   :  { %339 = vmatmul.f32.gmra.mxu3 %v205_v9  ;;  %417 = vmatmul.f32.gmra.mxu1 %v203_v54  ;;  %v1797_v9 = vsub.f32 %v441_v62, %v1786_v3 }
  0xc9   :  { %303 = vmatmul.f32.gmra.mxu2 %v1649_v38  ;;  %v449_v38 = vld [vmem:[#allocation7 + $0xa0] sm:$0xff]  ;;  %v554_v61 = vand.u32 4294901760, %v553_v55 }
  0xca   :  { %386 = vmatmul.f32.gmra.mxu0 %v1636_v30  ;;  %v1735_v42 = vand.u32 4294901760, %v449_v38  ;;  %v582_v15 = vand.u32 4294901760, %v1797_v9  ;;  %v429_v55 = vld [vmem:[#allocation7] sm:$0xff] }
  0xcb   :  { %v1852_v62 = vand.u32 4294901760, %v429_v55 }
  0xcc   :  { %v1746_v47 = vsub.f32 %v449_v38, %v1735_v42  ;;  %719 = vmatpush.msra.mxu1 %v1735_v42  ;;  %472 = vmatpush.msra.mxu2 %v1735_v42  ;;  %v583_v27 = vsub.f32 %v1797_v9, %v582_v15  ;;  %v1831_v38 = vand.u32 4294901760, %v433_v28 }
  0xce   :  { %v558_v52 = vand.u32 4294901760, %v1746_v47  ;;  %721 = vmatpush.msra.mxu1 %v1748_v48  ;;  %474 = vmatpush.msra.mxu2 %v1748_v48  ;;  %v584_v39 = vand.u32 4294901760, %v583_v27 }
  0xd0   :  { %345 = vmatmul.f32.gmra.mxu3 %v213_v50  ;;  %421 = vmatmul.f32.gmra.mxu1 %v1636_v30  ;;  %v1711_v30 = vsub.f32 %v455_v23, %v1702_v26  ;;  %v445_v50 = vld [vmem:[#allocation7 + $0x80] sm:$0xff]  ;;  %v559_v57 = vsub.f32 %v1746_v47, %v558_v52  ;;  %v1816_v23 = vand.u32 4294901760, %v435_v16 }
  0xd1   :  { %308 = vmatmul.f32.gmra.mxu2 %v220_v59  ;;  %v1757_v54 = vand.u32 4294901760, %v445_v50 }
  0xd2   :  { %390 = vmatmul.f32.gmra.mxu0 %v1662_v51  ;;  %v540_v35 = vand.u32 4294901760, %v1711_v30  ;;  %v560_v63 = vand.u32 4294901760, %v559_v57  ;;  %v1829_v34 = vsub.f32 %v435_v16, %v1816_v23  ;;  %v460_v16 = vld [vmem:[#allocation7 + $0xf8] sm:$0xff] }
  0xd3   :  { %647 = vmatpush.msra.mxu0 %v1711_v30  ;;  %v1770_v59 = vsub.f32 %v445_v50, %v1757_v54  ;;  %723 = vmatpush.msra.mxu1 %v1757_v54  ;;  %v1841_v50 = vsub.f32 %v433_v28, %v1831_v38  ;;  %v1882_v28 = vand.u32 4294901760, %v460_v16 }
  0xd4   :  { %v541_v40 = vsub.f32 %v1711_v30, %v540_v35  ;;  %476 = vmatpush.msra.mxu2 %v1757_v54  ;;  %v452_v30 = vld [vmem:[#allocation7 + $0xb8] sm:$0xff] }
  0xd5   :  { %650 = vmatpush.msra.mxu0 %v1723_v36  ;;  %v570_v1 = vand.u32 4294901760, %v1770_v59  ;;  %725 = vmatpush.msra.mxu1 %v1772_v60 }
  0xd6   :  { %v542_v45 = vand.u32 4294901760, %v541_v40  ;;  %478 = vmatpush.msra.mxu2 %v1772_v60  ;;  %v431_v40 = vld [vmem:[#allocation7 + $0x10] sm:$0xff] }
  0xd7   :  { %653 = vmatpush.msra.mxu0 %v1738_v43  ;;  %v571_v6 = vsub.f32 %v1770_v59, %v570_v1  ;;  %727 = vmatpush.msra.mxu1 %v1786_v3 }
  0xd8   :  { %351 = vmatmul.f32.gmra.mxu3 %v221_v7  ;;  %425 = vmatmul.f32.gmra.mxu1 %v1662_v51  ;;  %v548_v51 = vand.u32 4294901760, %v547_v46  ;;  %v576_v7 = vand.u32 4294901760, %v1782_v2  ;;  %v600_v46 = vand.u32 4294901760, %v1829_v34 }
  0xd9   :  { %543 = vmatpush.msra.mxu3 %v542_v45  ;;  %656 = vmatpush.msra.mxu0 %v1746_v47  ;;  %v572_v11 = vand.u32 4294901760, %v571_v6  ;;  %v595_v45 = vsub.f32 %v1814_v20, %v594_v33 }
  0xda   :  { %v577_v12 = vsub.f32 %v1782_v2, %v576_v7  ;;  %480 = vmatpush.msra.mxu2 %v1786_v3  ;;  %729 = vmatpush.msra.mxu1 %v1792_v8  ;;  %v601_v57 = vsub.f32 %v1829_v34, %v600_v46 }
  0xdb   :  { %549 = vmatpush.msra.mxu3 %v548_v51  ;;  %659 = vmatpush.msra.mxu0 %v1755_v53  ;;  %v1846_v51 = vand.u32 4294901760, %v431_v40  ;;  %v596_v56 = vand.u32 4294901760, %v595_v45  ;;  %v444_v53 = vld [vmem:[#allocation7 + $0x78] sm:$0xff] }
  0xdc   :  { %v578_v17 = vand.u32 4294901760, %v577_v12  ;;  %482 = vmatpush.msra.mxu2 %v1792_v8  ;;  %731 = vmatpush.msra.mxu1 %v1806_v14  ;;  %v602_v0 = vand.u32 4294901760, %v601_v57 }
  0xdd   :  { %555 = vmatpush.msra.mxu3 %v554_v61  ;;  %662 = vmatpush.msra.mxu0 %v1770_v59  ;;  %v606_v61 = vand.u32 4294901760, %v1841_v50 }
  0xde   :  { %484 = vmatpush.msra.mxu2 %v1806_v14  ;;  %733 = vmatpush.msra.mxu1 %v1816_v23 }
  0xdf   :  { %561 = vmatpush.msra.mxu3 %v560_v63  ;;  %665 = vmatpush.msra.mxu0 %v1782_v2  ;;  %v1857_v63 = vsub.f32 %v431_v40, %v1846_v51  ;;  %v607_v4 = vsub.f32 %v1841_v50, %v606_v61 }
  0xe0   :  { %486 = vmatpush.msra.mxu2 %v1816_v23  ;;  %735 = vmatpush.msra.mxu1 %v1831_v38 }
  0xe1   :  { %567 = vmatpush.msra.mxu3 %v566_v5  ;;  %668 = vmatpush.msra.mxu0 %v1797_v9  ;;  %v1864_v5 = vsub.f32 %v429_v55, %v1852_v62  ;;  %v612_v6 = vand.u32 4294901760, %v1857_v63  ;;  %v608_v10 = vand.u32 4294901760, %v607_v4 }
  0xe2   :  { %488 = vmatpush.msra.mxu2 %v1831_v38  ;;  %737 = vmatpush.msra.mxu1 %v1846_v51 }
  0xe3   :  { %573 = vmatpush.msra.mxu3 %v572_v11  ;;  %671 = vmatpush.msra.mxu0 %v1804_v13  ;;  %v618_v11 = vand.u32 4294901760, %v1864_v5  ;;  %v613_v12 = vsub.f32 %v1857_v63, %v612_v6 }
  0xe4   :  { %490 = vmatpush.msra.mxu2 %v1846_v51  ;;  %739 = vmatpush.msra.mxu1 %v1852_v62 }
  0xe5   :  { %579 = vmatpush.msra.mxu3 %v578_v17  ;;  %674 = vmatpush.msra.mxu0 %v1814_v20  ;;  %v619_v27 = vsub.f32 %v1864_v5, %v618_v11  ;;  %v614_v32 = vand.u32 4294901760, %v613_v12 }
  0xe6   :  { %492 = vmatpush.msra.mxu2 %v1852_v62 }
  0xe7   :  { %585 = vmatpush.msra.mxu3 %v584_v39  ;;  %677 = vmatpush.msra.mxu0 %v1829_v34  ;;  %v458_v39 = vld [vmem:[#allocation7 + $0xe8] sm:$0xff]  ;;  %v620_v40 = vand.u32 4294901760, %v619_v27  ;;  %v1926_v27 = vand.u32 4294901760, %v452_v30 }
  0xe8   :  { %768 = vmatpush.msrb.mxu2 %v528_v24  ;;  %v1890_v45 = vand.u32 4294901760, %v458_v39 }
  0xe9   :  { %591 = vmatpush.msra.mxu3 %v590_v44  ;;  %680 = vmatpush.msra.mxu0 %v1841_v50  ;;  %v1888_v44 = vsub.f32 %v460_v16, %v1882_v28 }
  0xea   :  { %772 = vmatpush.msrb.mxu2 %v534_v29  ;;  %v1901_v57 = vsub.f32 %v458_v39, %v1890_v45  ;;  %v450_v39 = vld [vmem:[#allocation7 + $0xa8] sm:$0xff] }
  0xeb   :  { %597 = vmatpush.msra.mxu3 %v596_v56  ;;  %683 = vmatpush.msra.mxu0 %v1857_v63  ;;  %v456_v56 = vld [vmem:[#allocation7 + $0xd8] sm:$0xff]  ;;  %v2317_v21 = vand.u32 4294901760, %v1888_v44 }
  0xec   :  { %v1898_v24 = vand.u32 4294901760, %v456_v56  ;;  %776 = vmatpush.msrb.mxu2 %v540_v35  ;;  %v2312_v29 = vand.u32 4294901760, %v1901_v57 }
  0xed   :  { %603 = vmatpush.msra.mxu3 %v602_v0  ;;  %686 = vmatpush.msra.mxu0 %v1864_v5  ;;  %v454_v0 = vld [vmem:[#allocation7 + $0xc8] sm:$0xff]  ;;  %v963_v25 = vsub.f32 %v1888_v44, %v2317_v21 }
  0xee   :  { %v1911_v4 = vand.u32 4294901760, %v454_v0  ;;  %780 = vmatpush.msrb.mxu2 %v546_v41  ;;  %v969_v35 = vsub.f32 %v1901_v57, %v2312_v29  ;;  %v446_v29 = vld [vmem:[#allocation7 + $0x88] sm:$0xff] }
  0xef   :  { %609 = vmatpush.msra.mxu3 %v608_v10  ;;  %896 = vmatpush.msrb.mxu0 %v1882_v28  ;;  %v1914_v10 = vsub.f32 %v456_v56, %v1898_v24  ;;  %v1941_v56 = vand.u32 4294901760, %v450_v39  ;;  %v1967_v47 = vand.u32 4294901760, %v446_v29 }
  0xf0   :  { %784 = vmatpush.msrb.mxu2 %v552_v49  ;;  %v970_v41 = vand.u32 4294901760, %v969_v35  ;;  %v1948_v49 = vsub.f32 %v452_v30, %v1926_v27 }
  0xf1   :  { %615 = vmatpush.msra.mxu3 %v614_v32  ;;  %898 = vmatpush.msrb.mxu0 %v1890_v45  ;;  %v2311_v16 = vand.u32 4294901760, %v1914_v10  ;;  %v1929_v32 = vsub.f32 %v454_v0, %v1911_v4  ;;  %v1956_v35 = vsub.f32 %v450_v39, %v1941_v56 }
  0xf2   :  { %788 = vmatpush.msrb.mxu2 %v558_v52  ;;  %v2313_v30 = vand.u32 4294901760, %v1948_v49 }
  0xf3   :  { %621 = vmatpush.msra.mxu3 %v620_v40  ;;  %900 = vmatpush.msrb.mxu0 %v1898_v24  ;;  %v975_v40 = vsub.f32 %v1914_v10, %v2311_v16  ;;  %v2315_v43 = vand.u32 4294901760, %v1929_v32 }
  0xf4   :  { %792 = vmatpush.msrb.mxu2 %v564_v58 }
  0xf5   :  { %847 = vmatpush.msrb.mxu3 %v1688_v19  ;;  %v964_v19 = vand.u32 4294901760, %v963_v25  ;;  %902 = vmatpush.msrb.mxu0 %v1911_v4  ;;  %v448_v25 = vld [vmem:[#allocation7 + $0x98] sm:$0xff]  ;;  %v981_v16 = vsub.f32 %v1929_v32, %v2315_v43 }
  0xf6   :  { %796 = vmatpush.msrb.mxu2 %v570_v1 }
  0xf7   :  { %849 = vmatpush.msrb.mxu3 %v1693_v22  ;;  %965 = vmatpush.msrb.mxu1 %v964_v19  ;;  %v1953_v19 = vand.u32 4294901760, %v448_v25 }
  0xf8   :  { %904 = vmatpush.msrb.mxu0 %v1926_v27  ;;  %800 = vmatpush.msrb.mxu2 %v576_v7 }
  0xf9   :  { %851 = vmatpush.msrb.mxu3 %v1702_v26  ;;  %971 = vmatpush.msrb.mxu1 %v970_v41  ;;  %v976_v26 = vand.u32 4294901760, %v975_v40  ;;  %v1970_v52 = vsub.f32 %v448_v25, %v1953_v19  ;;  %v982_v41 = vand.u32 4294901760, %v981_v16  ;;  %v987_v40 = vsub.f32 %v1948_v49, %v2313_v30  ;;  %v442_v30 = vld [vmem:[#allocation7 + $0x68] sm:$0xff] }
  0xfa   :  { %906 = vmatpush.msrb.mxu0 %v1941_v56  ;;  %v1985_v25 = vand.u32 4294901760, %v444_v53  ;;  %804 = vmatpush.msrb.mxu2 %v582_v15 }
  0xfb   :  { %853 = vmatpush.msrb.mxu3 %v1714_v31  ;;  %977 = vmatpush.msrb.mxu1 %v976_v26  ;;  %v2314_v31 = vand.u32 4294901760, %v1956_v35  ;;  %v2316_v58 = vand.u32 4294901760, %v1970_v52  ;;  %v988_v16 = vand.u32 4294901760, %v987_v40  ;;  %v1989_v26 = vsub.f32 %v446_v29, %v1967_v47 }
  0xfc   :  { %908 = vmatpush.msrb.mxu0 %v1953_v19  ;;  %808 = vmatpush.msrb.mxu2 %v588_v18 }
  0xfd   :  { %855 = vmatpush.msrb.mxu3 %v1727_v37  ;;  %v993_v37 = vsub.f32 %v1956_v35, %v2314_v31  ;;  %983 = vmatpush.msrb.mxu1 %v982_v41  ;;  %v999_v1 = vsub.f32 %v1970_v52, %v2316_v58  ;;  %v1997_v31 = vand.u32 4294901760, %v442_v30  ;;  %v2000_v41 = vsub.f32 %v444_v53, %v1985_v25  ;;  %v438_v53 = vld [vmem:[#allocation7 + $0x48] sm:$0xff] }
  0xfe   :  { %910 = vmatpush.msrb.mxu0 %v1967_v47  ;;  %v2319_v40 = vand.u32 4294901760, %v1989_v26  ;;  %812 = vmatpush.msrb.mxu2 %v594_v33 }
  0xff   :  { %857 = vmatpush.msrb.mxu3 %v1735_v42  ;;  %v994_v42 = vand.u32 4294901760, %v993_v37  ;;  %989 = vmatpush.msrb.mxu1 %v988_v16  ;;  %v1000_v43 = vand.u32 4294901760, %v999_v1  ;;  %v2318_v58 = vand.u32 4294901760, %v2000_v41  ;;  %v2017_v7 = vsub.f32 %v442_v30, %v1997_v31  ;;  %v436_v1 = vld [vmem:[#allocation7 + $0x38] sm:$0xff] }
 0x100   :  { %912 = vmatpush.msrb.mxu0 %v1985_v25  ;;  %v1005_v2 = vsub.f32 %v1989_v26, %v2319_v40  ;;  %v2023_v16 = vand.u32 4294901760, %v438_v53  ;;  %v2036_v40 = vand.u32 4294901760, %v436_v1  ;;  %816 = vmatpush.msrb.mxu2 %v600_v46 }
 0x101   :  { %859 = vmatpush.msrb.mxu3 %v1748_v48  ;;  %v440_v48 = vld [vmem:[#allocation7 + $0x58] sm:$0xff]  ;;  %995 = vmatpush.msrb.mxu1 %v994_v42 }
 0x102   :  { %v2008_v21 = vand.u32 4294901760, %v440_v48  ;;  %914 = vmatpush.msrb.mxu0 %v1997_v31  ;;  %v1006_v42 = vand.u32 4294901760, %v1005_v2  ;;  %v2039_v13 = vsub.f32 %v438_v53, %v2023_v16  ;;  %v2055_v33 = vsub.f32 %v436_v1, %v2036_v40  ;;  %820 = vmatpush.msrb.mxu2 %v606_v61 }
 0x103   :  { %861 = vmatpush.msrb.mxu3 %v1757_v54  ;;  %v1011_v54 = vsub.f32 %v2000_v41, %v2318_v58  ;;  %1001 = vmatpush.msrb.mxu1 %v1000_v43 }
 0x104   :  { %v2026_v9 = vsub.f32 %v440_v48, %v2008_v21  ;;  %916 = vmatpush.msrb.mxu0 %v2008_v21  ;;  %v1028_v2 = vand.u32 4294901760, %v2039_v13  ;;  %v1034_v1 = vand.u32 4294901760, %v2055_v33  ;;  %824 = vmatpush.msrb.mxu2 %v612_v6 }
 0x105   :  { %863 = vmatpush.msrb.mxu3 %v1772_v60  ;;  %v1016_v60 = vand.u32 4294901760, %v2017_v7  ;;  %v1012_v58 = vand.u32 4294901760, %v1011_v54  ;;  %1007 = vmatpush.msrb.mxu1 %v1006_v42 }
 0x106   :  { %v1022_v48 = vand.u32 4294901760, %v2026_v9  ;;  %918 = vmatpush.msrb.mxu0 %v2023_v16  ;;  %v1029_v42 = vsub.f32 %v2039_v13, %v1028_v2  ;;  %828 = vmatpush.msrb.mxu2 %v618_v11 }
 0x107   :  { %865 = vmatpush.msrb.mxu3 %v1786_v3  ;;  %v434_v3 = vld [vmem:[#allocation7 + $0x28] sm:$0xff]  ;;  %1013 = vmatpush.msrb.mxu1 %v1012_v58 }
 0x108   :  { %v1023_v43 = vsub.f32 %v2026_v9, %v1022_v48  ;;  %v2052_v20 = vand.u32 4294901760, %v434_v3  ;;  %920 = vmatpush.msrb.mxu0 %v2036_v40 }
 0x109   :  { %867 = vmatpush.msrb.mxu3 %v1792_v8  ;;  %v432_v8 = vld [vmem:[#allocation7 + $0x18] sm:$0xff] }
 0x10a   :  { %922 = vmatpush.msrb.mxu0 %v2052_v20  ;;  %v2068_v46 = vand.u32 4294901760, %v432_v8  ;;  %v2071_v58 = vsub.f32 %v434_v3, %v2052_v20 }
 0x10b   :  { %869 = vmatpush.msrb.mxu3 %v1806_v14  ;;  %v430_v14 = vld [vmem:[#allocation7 + $0x8] sm:$0xff] }
 0x10c   :  { %v2077_v50 = vand.u32 4294901760, %v430_v14  ;;  %924 = vmatpush.msrb.mxu0 %v2068_v46  ;;  %v1040_v3 = vand.u32 4294901760, %v2071_v58 }
 0x10d   :  { %871 = vmatpush.msrb.mxu3 %v1816_v23  ;;  %v2086_v23 = vsub.f32 %v432_v8, %v2068_v46 }
 0x10e   :  { %926 = vmatpush.msrb.mxu0 %v2077_v50 }
 0x10f   :  { %873 = vmatpush.msrb.mxu3 %v1831_v38 }
 0x111   :  { %875 = vmatpush.msrb.mxu3 %v1846_v51 }
 0x113   :  { %877 = vmatpush.msrb.mxu3 %v1852_v62 }
 0x127   :  { %v1877_v17 = vpop.f32.mrf.mxu0 }
 0x12c   :  { %v1894_v55 = vpop.f32.mrf.mxu2 }
 0x12d   :  { %v1916_v12 = vpop.f32.mrf.mxu1 }
 0x12e   :  { %v257_v15 = vadd.f32 %v1916_v12, %v1877_v17  ;;  %v1017_v17 = vsub.f32 %v2017_v7, %v1016_v60 }
 0x12f   :  { %v1935_v22 = vpop.f32.mrf.mxu0 }
 0x130   :  { %v1018_v54 = vand.u32 4294901760, %v1017_v17  ;;  %v1030_v17 = vand.u32 4294901760, %v1029_v42 }
 0x132   :  { %1019 = vmatpush.msrb.mxu1 %v1018_v54  ;;  %v2090_v54 = vsub.f32 %v430_v14, %v2077_v50 }
 0x133   :  { %v1933_v36 = vpop.f32.mrf.mxu3 }
 0x134   :  { %v1943_v0 = vpop.f32.mrf.mxu2  ;;  %v265_v62 = vadd.f32 %v1933_v36, %v1894_v55 }
 0x135   :  { %v1972_v39 = vpop.f32.mrf.mxu1 }
 0x136   :  { %v261_v61 = vadd.f32 %v1972_v39, %v1935_v22  ;;  %v1041_v22 = vsub.f32 %v2071_v58, %v1040_v3  ;;  %v1046_v39 = vand.u32 4294901760, %v2086_v23 }
 0x137   :  { %v379_v37 = vpop.f32.mrf.mxu0 }
 0x138   :  { %v1047_v8 = vsub.f32 %v2086_v23, %v1046_v39 }
 0x13a   :  { %v1048_v14 = vand.u32 4294901760, %v1047_v8 }
 0x13b   :  { %v1991_v59 = vpop.f32.mrf.mxu3 }
 0x13c   :  { %v294_v29 = vpop.f32.mrf.mxu2 }
 0x13d   :  { %v414_v30 = vpop.f32.mrf.mxu1  ;;  %v295_v18 = vadd.f32 %v294_v29, %v257_v15  ;;  %v1024_v15 = vand.u32 4294901760, %v1023_v43 }
 0x13f   :  { %1025 = vmatpush.msrb.mxu1 %v1024_v15 }
 0x141   :  { %1031 = vmatpush.msrb.mxu1 %v1030_v17 }
 0x143   :  { %v334_v12 = vpop.f32.mrf.mxu3 }
 0x144   :  { %v299_v29 = vpop.f32.mrf.mxu2  ;;  %v335_v53 = vadd.f32 %v334_v12, %v295_v18  ;;  %v383_v18 = vpop.f32.mrf.mxu0  ;;  %v1035_v12 = vsub.f32 %v2055_v33, %v1034_v1 }
 0x145   :  { %v418_v43 = vpop.f32.mrf.mxu1  ;;  %v300_v63 = vadd.f32 %v299_v29, %v261_v61  ;;  %v1042_v29 = vand.u32 4294901760, %v1041_v22 }
 0x146   :  { %v380_v34 = vadd.f32 %v379_v37, %v335_v53  ;;  %v1036_v53 = vand.u32 4294901760, %v1035_v12  ;;  %v2320_v12 = vand.u32 4294901760, %v1888_v44 }
 0x148   :  { %v415_v37 = vadd.f32 %v414_v30, %v380_v34  ;;  %v1052_v30 = vand.u32 4294901760, %v2090_v54  ;;  %1037 = vmatpush.msrb.mxu1 %v1036_v53 }
 0x14a   :  { %v2094_v6 = vand.u32 4294901760, %v415_v37  ;;  %v1053_v51 = vsub.f32 %v2090_v54, %v1052_v30  ;;  %1043 = vmatpush.msrb.mxu1 %v1042_v29 }
 0x14b   :  { %v340_v38 = vpop.f32.mrf.mxu3 }
 0x14c   :  { %v2104_v5 = vsub.f32 %v415_v37, %v2094_v6  ;;  %v341_v11 = vadd.f32 %v340_v38, %v300_v63  ;;  %623 = vmatmul.f32.vlgmr.msra.gmra.mxu3 %v2094_v6  ;;  %v304_v15 = vpop.f32.mrf.mxu2  ;;  %v1054_v17 = vand.u32 4294901760, %v1053_v51  ;;  %v387_v37 = vpop.f32.mrf.mxu0  ;;  %1049 = vmatpush.msrb.mxu1 %v1048_v14  ;;  %v2321_v38 = vand.u32 4294901760, %v1901_v57 }
 0x14d   :  { %1143 = vmatpush.msra.mxu3 %v1882_v28  ;;  %v305_v53 = vadd.f32 %v304_v15, %v265_v62  ;;  %v422_v55 = vpop.f32.mrf.mxu1  ;;  %v2322_v51 = vand.u32 4294901760, %v1914_v10  ;;  %v2324_v62 = vand.u32 4294901760, %v1948_v49 }
 0x14e   :  { %v384_v42 = vadd.f32 %v383_v18, %v341_v11  ;;  %689 = vmatmul.f32.vlgmr.msra.gmra.mxu0 %v2104_v5  ;;  %v2116_v34 = vand.u32 4294901760, %v2104_v5  ;;  %1055 = vmatpush.msrb.mxu1 %v1054_v17  ;;  %v2323_v17 = vand.u32 4294901760, %v1929_v32 }
 0x14f   :  { %1202 = vmatpush.msra.mxu0 %v2320_v12  ;;  %1145 = vmatpush.msra.mxu3 %v1890_v45 }
 0x150   :  { %v419_v61 = vadd.f32 %v418_v43, %v384_v42  ;;  %743 = vmatmul.f32.vlgmr.msra.gmra.mxu1 %v2116_v34  ;;  %v496_v18 = vsub.f32 %v2104_v5, %v2116_v34  ;;  %v269_v42 = vadd.f32 %v1991_v59, %v1943_v0 }
 0x151   :  { %1206 = vmatpush.msra.mxu0 %v2321_v38  ;;  %1147 = vmatpush.msra.mxu3 %v1898_v24  ;;  %v2326_v38 = vand.u32 4294901760, %v1970_v52 }
 0x152   :  { %v2127_v63 = vand.u32 4294901760, %v419_v61  ;;  %v2129_v22 = vand.u32 4294901760, %v496_v18  ;;  %1281 = vmatpush.msra.mxu1 %v1882_v28 }
 0x153   :  { %v346_v11 = vpop.f32.mrf.mxu3  ;;  %1149 = vmatpush.msra.mxu3 %v1911_v4  ;;  %1210 = vmatpush.msra.mxu0 %v2322_v51 }
 0x154   :  { %v2135_v36 = vsub.f32 %v419_v61, %v2127_v63  ;;  %v347_v43 = vadd.f32 %v346_v11, %v305_v53  ;;  %498 = vmatmul.f32.vlgmr.msra.gmra.mxu2 %v2129_v22  ;;  %627 = vmatmul.f32.gmra.mxu3 %v2127_v63  ;;  %v309_v15 = vpop.f32.mrf.mxu2  ;;  %v391_v59 = vpop.f32.mrf.mxu0 }
 0x155   :  { %1075 = vmatpush.msra.mxu2 %v1888_v44  ;;  %1283 = vmatpush.msra.mxu1 %v1890_v45  ;;  %v310_v44 = vadd.f32 %v309_v15, %v269_v42  ;;  %v426_v18 = vpop.f32.mrf.mxu1 }
 0x156   :  { %v388_v29 = vadd.f32 %v387_v37, %v347_v43  ;;  %694 = vmatmul.f32.gmra.mxu0 %v2135_v36  ;;  %v2143_v8 = vand.u32 4294901760, %v2135_v36  ;;  %1151 = vmatpush.msra.mxu3 %v1926_v27 }
 0x157   :  { %1214 = vmatpush.msra.mxu0 %v2323_v17  ;;  %1285 = vmatpush.msra.mxu1 %v1898_v24 }
 0x158   :  { %v423_v28 = vadd.f32 %v422_v55, %v388_v29  ;;  %749 = vmatmul.f32.gmra.mxu1 %v2143_v8  ;;  %v504_v14 = vsub.f32 %v2135_v36, %v2143_v8  ;;  %1078 = vmatpush.msra.mxu2 %v1901_v57 }
 0x159   :  { %1153 = vmatpush.msra.mxu3 %v1941_v56  ;;  %1218 = vmatpush.msra.mxu0 %v2324_v62 }
 0x15a   :  { %v2158_v12 = vand.u32 4294901760, %v423_v28  ;;  %v2160_v45 = vand.u32 4294901760, %v504_v14  ;;  %1287 = vmatpush.msra.mxu1 %v1911_v4  ;;  %1081 = vmatpush.msra.mxu2 %v1914_v10  ;;  %v2325_v4 = vand.u32 4294901760, %v1956_v35 }
 0x15b   :  { %v352_v0 = vpop.f32.mrf.mxu3  ;;  %1155 = vmatpush.msra.mxu3 %v1953_v19 }
 0x15c   :  { %v2168_v61 = vsub.f32 %v423_v28, %v2158_v12  ;;  %v353_v24 = vadd.f32 %v352_v0, %v310_v44  ;;  %506 = vmatmul.f32.gmra.mxu2 %v2160_v45  ;;  %631 = vmatmul.f32.gmra.mxu3 %v2158_v12 }
 0x15d   :  { %1289 = vmatpush.msra.mxu1 %v1926_v27  ;;  %1222 = vmatpush.msra.mxu0 %v2325_v4 }
 0x15e   :  { %v392_v57 = vadd.f32 %v391_v59, %v353_v24  ;;  %699 = vmatmul.f32.gmra.mxu0 %v2168_v61  ;;  %v2176_v37 = vand.u32 4294901760, %v2168_v61  ;;  %1084 = vmatpush.msra.mxu2 %v1929_v32  ;;  %v2327_v32 = vand.u32 4294901760, %v1989_v26 }
 0x15f   :  { %1157 = vmatpush.msra.mxu3 %v1967_v47  ;;  %1226 = vmatpush.msra.mxu0 %v2326_v38 }
 0x160   :  { %v427_v53 = vadd.f32 %v426_v18, %v392_v57  ;;  %755 = vmatmul.f32.gmra.mxu1 %v2176_v37  ;;  %v512_v10 = vsub.f32 %v2168_v61, %v2176_v37  ;;  %1087 = vmatpush.msra.mxu2 %v1948_v49  ;;  %v2328_v49 = vand.u32 4294901760, %v2000_v41 }
 0x161   :  { %1291 = vmatpush.msra.mxu1 %v1941_v56  ;;  %1159 = vmatpush.msra.mxu3 %v1985_v25 }
 0x162   :  { %v2189_v11 = vand.u32 4294901760, %v427_v53  ;;  %v513_v27 = vand.u32 4294901760, %v512_v10  ;;  %1230 = vmatpush.msra.mxu0 %v2327_v32  ;;  %1090 = vmatpush.msra.mxu2 %v1956_v35 }
 0x163   :  { %1293 = vmatpush.msra.mxu1 %v1953_v19  ;;  %1161 = vmatpush.msra.mxu3 %v1997_v31 }
 0x164   :  { %v2197_v55 = vsub.f32 %v427_v53, %v2189_v11  ;;  %514 = vmatmul.f32.gmra.mxu2 %v513_v27  ;;  %635 = vmatmul.f32.gmra.mxu3 %v2189_v11 }
 0x165   :  { %1295 = vmatpush.msra.mxu1 %v1967_v47  ;;  %1234 = vmatpush.msra.mxu0 %v2328_v49 }
 0x166   :  { %704 = vmatmul.f32.gmra.mxu0 %v2197_v55  ;;  %v2204_v56 = vand.u32 4294901760, %v2197_v55  ;;  %1093 = vmatpush.msra.mxu2 %v1970_v52 }
 0x167   :  { %1163 = vmatpush.msra.mxu3 %v2008_v21  ;;  %1238 = vmatpush.msra.mxu0 %v1016_v60 }
 0x168   :  { %761 = vmatmul.f32.gmra.mxu1 %v2204_v56  ;;  %v520_v19 = vsub.f32 %v2197_v55, %v2204_v56  ;;  %1096 = vmatpush.msra.mxu2 %v1989_v26 }
 0x169   :  { %1297 = vmatpush.msra.mxu1 %v1985_v25  ;;  %1165 = vmatpush.msra.mxu3 %v2023_v16 }
 0x16a   :  { %v521_v35 = vand.u32 4294901760, %v520_v19  ;;  %1242 = vmatpush.msra.mxu0 %v1022_v48  ;;  %1099 = vmatpush.msra.mxu2 %v2000_v41 }
 0x16b   :  { %1299 = vmatpush.msra.mxu1 %v1997_v31  ;;  %1167 = vmatpush.msra.mxu3 %v2036_v40 }
 0x16c   :  { %522 = vmatmul.f32.gmra.mxu2 %v521_v35  ;;  %879 = vmatmul.f32.vlgmr.msrb.gmra.mxu3 %v2094_v6 }
 0x16d   :  { %1301 = vmatpush.msra.mxu1 %v2008_v21  ;;  %1246 = vmatpush.msra.mxu0 %v1028_v2 }
 0x16e   :  { %932 = vmatmul.f32.vlgmr.msrb.gmra.mxu0 %v2129_v22  ;;  %1102 = vmatpush.msra.mxu2 %v2017_v7 }
 0x16f   :  { %1169 = vmatpush.msra.mxu3 %v2052_v20  ;;  %1250 = vmatpush.msra.mxu0 %v1034_v1 }
 0x170   :  { %1057 = vmatmul.f32.vlgmr.msrb.gmra.mxu1 %v2094_v6  ;;  %1105 = vmatpush.msra.mxu2 %v2026_v9 }
 0x171   :  { %1303 = vmatpush.msra.mxu1 %v2023_v16  ;;  %1171 = vmatpush.msra.mxu3 %v2068_v46 }
 0x172   :  { %1254 = vmatpush.msra.mxu0 %v1040_v3  ;;  %1108 = vmatpush.msra.mxu2 %v2039_v13 }
 0x173   :  { %1305 = vmatpush.msra.mxu1 %v2036_v40  ;;  %1173 = vmatpush.msra.mxu3 %v2077_v50 }
 0x174   :  { %830 = vmatmul.f32.vlgmr.msrb.gmra.mxu2 %v2094_v6  ;;  %883 = vmatmul.f32.gmra.mxu3 %v2127_v63 }
 0x175   :  { %1307 = vmatpush.msra.mxu1 %v2052_v20  ;;  %1258 = vmatpush.msra.mxu0 %v1046_v39 }
 0x176   :  { %940 = vmatmul.f32.gmra.mxu0 %v2160_v45  ;;  %1111 = vmatpush.msra.mxu2 %v2055_v33 }
 0x177   :  { %1262 = vmatpush.msra.mxu0 %v1052_v30  ;;  %1309 = vmatpush.msra.mxu1 %v2068_v46 }
 0x178   :  { %1061 = vmatmul.f32.gmra.mxu1 %v2127_v63  ;;  %1114 = vmatpush.msra.mxu2 %v2071_v58 }
 0x179   :  { %1311 = vmatpush.msra.mxu1 %v2077_v50 }
 0x17a   :  { %1117 = vmatpush.msra.mxu2 %v2086_v23 }
 0x17c   :  { %834 = vmatmul.f32.gmra.mxu2 %v2127_v63  ;;  %887 = vmatmul.f32.gmra.mxu3 %v2158_v12 }
 0x17d   :  { %1120 = vmatpush.msra.mxu2 %v2090_v54 }
 0x17e   :  { %948 = vmatmul.f32.gmra.mxu0 %v513_v27 }
 0x180   :  { %1065 = vmatmul.f32.gmra.mxu1 %v2158_v12 }
 0x184   :  { %838 = vmatmul.f32.gmra.mxu2 %v2158_v12  ;;  %891 = vmatmul.f32.gmra.mxu3 %v2189_v11 }
 0x186   :  { %956 = vmatmul.f32.gmra.mxu0 %v521_v35 }
 0x188   :  { %1069 = vmatmul.f32.gmra.mxu1 %v2189_v11 }
 0x18c   :  { %842 = vmatmul.f32.gmra.mxu2 %v2189_v11  ;;  %1177 = vmatmul.f32.vlgmr.msra.gmra.mxu3 %v2116_v34 }
 0x18e   :  { %1264 = vmatmul.f32.vlgmr.msra.gmra.mxu0 %v2094_v6 }
 0x190   :  { %1313 = vmatmul.f32.vlgmr.msra.gmra.mxu1 %v2094_v6 }
 0x194   :  { %1123 = vmatmul.f32.vlgmr.msra.gmra.mxu2 %v2104_v5  ;;  %1183 = vmatmul.f32.gmra.mxu3 %v2143_v8 }
 0x196   :  { %1268 = vmatmul.f32.gmra.mxu0 %v2127_v63 }
 0x198   :  { %1317 = vmatmul.f32.gmra.mxu1 %v2127_v63 }
 0x19c   :  { %1128 = vmatmul.f32.gmra.mxu2 %v2135_v36  ;;  %1189 = vmatmul.f32.gmra.mxu3 %v2176_v37 }
 0x19e   :  { %1272 = vmatmul.f32.gmra.mxu0 %v2158_v12 }
 0x1a0   :  { %1321 = vmatmul.f32.gmra.mxu1 %v2158_v12 }
 0x1a4   :  { %1133 = vmatmul.f32.gmra.mxu2 %v2168_v61  ;;  %1195 = vmatmul.f32.gmra.mxu3 %v2204_v56 }
 0x1a6   :  { %1276 = vmatmul.f32.gmra.mxu0 %v2189_v11 }
 0x1a8   :  { %1325 = vmatmul.f32.gmra.mxu1 %v2189_v11 }
 0x1ac   :  { %1138 = vmatmul.f32.gmra.mxu2 %v2197_v55 }
 0x1cb   :  { %v690_v21 = vpop.f32.mrf.mxu0 }
 0x1cd   :  { %v744_v31 = vpop.f32.mrf.mxu1 }
 0x1cf   :  { %v624_v47 = vpop.f32.mrf.mxu3 }
 0x1d3   :  { %v695_v52 = vpop.f32.mrf.mxu0 }
 0x1d5   :  { %v750_v25 = vpop.f32.mrf.mxu1 }
 0x1d7   :  { %v499_v26 = vpop.f32.mrf.mxu2  ;;  %v628_v41 = vpop.f32.mrf.mxu3 }
 0x1d8   :  { %v625_v40 = vadd.f32 %v624_v47, %v499_v26 }
 0x1da   :  { %v691_v7 = vadd.f32 %v690_v21, %v625_v40 }
 0x1db   :  { %v700_v16 = vpop.f32.mrf.mxu0 }
 0x1dc   :  { %v745_v9 = vadd.f32 %v744_v31, %v691_v7 }
 0x1dd   :  { %v756_v60 = vpop.f32.mrf.mxu1 }
 0x1df   :  { %v507_v48 = vpop.f32.mrf.mxu2  ;;  %v632_v13 = vpop.f32.mrf.mxu3 }
 0x1e0   :  { %v629_v2 = vadd.f32 %v628_v41, %v507_v48 }
 0x1e2   :  { %v696_v20 = vadd.f32 %v695_v52, %v629_v2 }
 0x1e3   :  { %v705_v33 = vpop.f32.mrf.mxu0 }
 0x1e4   :  { %v2280_v1 = vadd.f32 %v750_v25, %v696_v20 }
 0x1e5   :  { %v762_v46 = vpop.f32.mrf.mxu1 }
 0x1e7   :  { %v515_v58 = vpop.f32.mrf.mxu2  ;;  %v636_v50 = vpop.f32.mrf.mxu3 }
 0x1e8   :  { %v633_v0 = vadd.f32 %v632_v13, %v515_v58 }
 0x1ea   :  { %v701_v18 = vadd.f32 %v700_v16, %v633_v0 }
 0x1eb   :  { %v933_v3 = vpop.f32.mrf.mxu0 }
 0x1ec   :  { %v757_v10 = vadd.f32 %v756_v60, %v701_v18 }
 0x1ed   :  { %v1058_v23 = vpop.f32.mrf.mxu1 }
 0x1ee   :  { %v1059_v12 = vadd.f32 %v1058_v23, %v933_v3 }
 0x1ef   :  { %v523_v54 = vpop.f32.mrf.mxu2  ;;  %v880_v6 = vpop.f32.mrf.mxu3 }
 0x1f0   :  { %v637_v4 = vadd.f32 %v636_v50, %v523_v54 }
 0x1f2   :  { %v706_v49 = vadd.f32 %v705_v33, %v637_v4 }
 0x1f3   :  { %v941_v39 = vpop.f32.mrf.mxu0 }
 0x1f4   :  { %v763_v40 = vadd.f32 %v762_v46, %v706_v49 }
 0x1f5   :  { %v1062_v34 = vpop.f32.mrf.mxu1 }
 0x1f6   :  { %v1063_v37 = vadd.f32 %v1062_v34, %v941_v39 }
 0x1f7   :  { %v831_v30 = vpop.f32.mrf.mxu2  ;;  %v2282_v5 = vpop.f32.mrf.mxu3 }
 0x1f8   :  { %v832_v19 = vadd.f32 %v831_v30, %v745_v9 }
 0x1fa   :  { %v881_v41 = vadd.f32 %v880_v6, %v832_v19 }
 0x1fb   :  { %v949_v36 = vpop.f32.mrf.mxu0 }
 0x1fd   :  { %v1066_v43 = vpop.f32.mrf.mxu1 }
 0x1fe   :  { %v1067_v53 = vadd.f32 %v1066_v43, %v949_v36 }
 0x1ff   :  { %v835_v63 = vpop.f32.mrf.mxu2  ;;  %v888_v22 = vpop.f32.mrf.mxu3 }
 0x200   :  { %v836_v33 = vadd.f32 %v835_v63, %v2280_v1 }
 0x203   :  { %v957_v15 = vpop.f32.mrf.mxu0 }
 0x205   :  { %v1070_v51 = vpop.f32.mrf.mxu1 }
 0x206   :  { %v1071_v7 = vadd.f32 %v1070_v51, %v957_v15 }
 0x207   :  { %v839_v29 = vpop.f32.mrf.mxu2  ;;  %v892_v8 = vpop.f32.mrf.mxu3 }
 0x208   :  { %v840_v55 = vadd.f32 %v839_v29, %v757_v10 }
 0x20a   :  { %v889_v25 = vadd.f32 %v888_v22, %v840_v55  ;;  %v885_v22 = vadd.f32 %v2282_v5, %v836_v33 }
 0x20b   :  { %v1265_v14 = vpop.f32.mrf.mxu0 }
 0x20d   :  { %v1314_v17 = vpop.f32.mrf.mxu1 }
 0x20f   :  { %v843_v42 = vpop.f32.mrf.mxu2  ;;  %v1178_v28 = vpop.f32.mrf.mxu3 }
 0x210   :  { %v844_v2 = vadd.f32 %v843_v42, %v763_v40 }
 0x212   :  { %v893_v30 = vadd.f32 %v892_v8, %v844_v2 }
 0x213   :  { %v1269_v62 = vpop.f32.mrf.mxu0 }
 0x215   :  { %v1318_v24 = vpop.f32.mrf.mxu1 }
 0x217   :  { %v1124_v44 = vpop.f32.mrf.mxu2  ;;  %v1184_v45 = vpop.f32.mrf.mxu3 }
 0x218   :  { %v1125_v59 = vadd.f32 %v1124_v44, %v1059_v12  ;;  %v1334_v12 = vld [vmem:[%s2307_s2 + $0x8] sm:$0xff] }
 0x21a   :  { %v1179_v57 = vadd.f32 %v1178_v28, %v1125_v59  ;;  %v1333_v28 = vld [vmem:[%s2307_s2] sm:$0xff] }
 0x21b   :  { %v1273_v35 = vpop.f32.mrf.mxu0 }
 0x21c   :  { %v1266_v38 = vadd.f32 %v1265_v14, %v1179_v57 }
 0x21d   :  { %v1322_v52 = vpop.f32.mrf.mxu1 }
 0x21e   :  { %v1315_v21 = vadd.f32 %v1314_v17, %v1266_v38 }
 0x21f   :  { %v1129_v61 = vpop.f32.mrf.mxu2  ;;  %v1190_v27 = vpop.f32.mrf.mxu3 }
 0x220   :  { %v1130_v11 = vadd.f32 %v1129_v61, %v1063_v37  ;;  %v1331_v16 = vadd.f32 %v1315_v21, %v889_v25 }
 0x222   :  { %v1185_v31 = vadd.f32 %v1184_v45, %v1130_v11  ;;  %v1337_v50 = vmul.f32 %v1331_v16, %v1331_v16 }
 0x223   :  { %v1277_v39 = vpop.f32.mrf.mxu0 }
 0x224   :  { %v1270_v60 = vadd.f32 %v1269_v62, %v1185_v31 }
 0x225   :  { %v1326_v46 = vpop.f32.mrf.mxu1 }
 0x226   :  { %v1319_v3 = vadd.f32 %v1318_v24, %v1270_v60 }
 0x227   :  { %v1134_v32 = vpop.f32.mrf.mxu2  ;;  %v1196_v9 = vpop.f32.mrf.mxu3 }
 0x228   :  { %v1135_v56 = vadd.f32 %v1134_v32, %v1067_v53  ;;  %v1332_v36 = vadd.f32 %v1319_v3, %v893_v30 }
 0x22a   :  { %v1191_v47 = vadd.f32 %v1190_v27, %v1135_v56  ;;  %v1338_v51 = vmul.f32 %v1332_v36, %v1332_v36 }
 0x22c   :  { %v1274_v26 = vadd.f32 %v1273_v35, %v1191_v47 }
 0x22e   :  { %v1323_v48 = vadd.f32 %v1322_v52, %v1274_v26 }
 0x22f   :  { %v1139_v13 = vpop.f32.mrf.mxu2 }
 0x230   :  { %v1329_v20 = vsub.f32 %v881_v41, %v1323_v48  ;;  %v1140_v58 = vadd.f32 %v1139_v13, %v1071_v7 }
 0x232   :  { %v1335_v23 = vmul.f32 %v1329_v20, %v1329_v20  ;;  %v1197_v54 = vadd.f32 %v1196_v9, %v1140_v58 }
 0x234   :  { %v1278_v34 = vadd.f32 %v1277_v39, %v1197_v54  ;;  %v1339_v6 = vadd.f32 %v1337_v50, %v1335_v23  ;;  %v1405_v50 = vlaneseq }
 0x236   :  { %v1327_v43 = vadd.f32 %v1326_v46, %v1278_v34  ;;  %v1341_v29 = vadd.f32 1e-30, %v1339_v6  ;;  %v1406_v3 = vand.u32 127, %v1405_v50  ;;  %v1408_v23 = vshrl.u32 %v1405_v50, 7 }
 0x238   :  { %v1330_v15 = vsub.f32 %v885_v22, %v1327_v43  ;;  %1465 = vlog2.f32 %v1341_v29  ;;  %vm1409_vm7 = vcmp.eq.s32.totalorder %v1408_v23, 0  ;;  %vm1414_vm8 = vcmp.eq.s32.totalorder %v1406_v3, 2 }
 0x239   :  { %vm1412_vm9 = vcmp.eq.s32.totalorder %v1406_v3, 1  ;;  %vm1410_vm10 = vcmp.eq.s32.totalorder %v1406_v3, 0  ;;  %vm1415_vm11 = vmand %vm1409_vm7, %vm1414_vm8 }
 0x23a   :  { %v1336_v42 = vmul.f32 %v1330_v15, %v1330_v15  ;;  %vm1413_vm12 = vmand %vm1409_vm7, %vm1412_vm9 }
 0x23b   :  { %vm1411_vm13 = vmand %vm1409_vm7, %vm1410_vm10 }
 0x23c   :  { %v1340_v1 = vadd.f32 %v1338_v51, %v1336_v42 }
 0x23e   :  { %v1466_v63 = vpop.eup %1465  ;;  %v1342_v14 = vadd.f32 1e-30, %v1340_v1 }
 0x23f   :  { %v1344_v8 = vmul.f32 0.6931472, %v1466_v63 }
 0x240   :  { %1467 = vlog2.f32 %v1342_v14 }
 0x241   :  { %v1347_v17 = vmul.f32 %v1344_v8, %v1333_v28 }
 0x243   :  { %1351 = vrot.lane.b32.xlu2 %v1347_v17, %s1580_s11  ;;  %v1371_v5 = vmul.f32 %v1347_v17, %v1347_v17 }
 0x245   :  { %1387 = vrot.lane.b32.xlu1 %v1371_v5, %s1580_s11  ;;  %v1373_v61 = vsel %vm149_vm3, %v1371_v5, 0.0 }
 0x246   :  { %v1468_v44 = vpop.eup %1467 }
 0x247   :  { %v1346_v45 = vmul.f32 0.6931472, %v1468_v44 }
 0x249   :  { %v1348_v0 = vmul.f32 %v1346_v45, %v1334_v12 }
 0x24b   :  { %1353 = vrot.lane.b32.xlu0 %v1348_v0, %s1580_s11  ;;  %v1372_v59 = vmul.f32 %v1348_v0, %v1348_v0 }
 0x24d   :  { %1389 = vrot.lane.b32.xlu2 %v1372_v59, %s1580_s11  ;;  %v1374_v62 = vsel %vm149_vm3, %v1372_v59, 0.0 }
 0x24e   :  { %v1375_v24 = vadd.f32 %v1374_v62, %v1373_v61 }
 0x26f   :  { %1376 = vadd.xlane.f32.xlu1 %v1375_v24 }
 0x29d   :  { %v1352_v18 = vpop.permute.xlu2 %1351 }
 0x29e   :  { %v1357_v38 = vmul.f32 %v1352_v18, %v1347_v17 }
 0x2a0   :  { %v1359_v32 = vsel %vm149_vm3, %v1357_v38, 0.0 }
 0x2a7   :  { %v1390_v57 = vpop.permute.xlu2 %1389 }
 0x2a8   :  { %v1394_v4 = vsel %vm149_vm3, %v1390_v57, 0.0 }
 0x2b7   :  { %v1388_v37 = vpop.permute.xlu1 %1387 }
 0x2b8   :  { %v1393_v53 = vsel %vm149_vm3, %v1388_v37, 0.0 }
 0x2b9   :  { %v1395_v10 = vadd.f32 %v1394_v4, %v1393_v53 }
 0x2bb   :  { %1396 = vadd.xlane.f32.xlu2 %v1395_v10 }
 0x2bd   :  { %v1354_v11 = vpop.permute.xlu0 %1353 }
 0x2be   :  { %v1358_v27 = vmul.f32 %v1354_v11, %v1348_v0 }
 0x2c0   :  { %v1360_v55 = vsel %vm149_vm3, %v1358_v27, 0.0 }
 0x2c1   :  { %v1361_v56 = vadd.f32 %v1360_v55, %v1359_v32 }
 0x2c3   :  { %1362 = vadd.xlane.f32.xlu0 %v1361_v56 }
 0x2e2   :  { %v1377_v49 = vpop.xlane.xlu1 %1376 }
 0x2e3   :  { %v1378_v19 = vrot.slane %v1377_v49, 4 }
 0x2e5   :  { %v1379_v31 = vadd.f32 %v1378_v19, %v1377_v49 }
 0x2e7   :  { %v1380_v52 = vrot.slane %v1379_v31, 2 }
 0x2e9   :  { %v1381_v7 = vadd.f32 %v1380_v52, %v1379_v31 }
 0x2eb   :  { %v1382_v13 = vrot.slane %v1381_v7, 1 }
 0x2ed   :  { %v1383_v33 = vadd.f32 %v1382_v13, %v1381_v7 }
 0x32e   :  { %v1397_v35 = vpop.xlane.xlu2 %1396 }
 0x32f   :  { %v1398_v21 = vrot.slane %v1397_v35, 4 }
 0x331   :  { %v1399_v47 = vadd.f32 %v1398_v21, %v1397_v35 }
 0x333   :  { %v1400_v26 = vrot.slane %v1399_v47, 2 }
 0x335   :  { %v1401_v16 = vadd.f32 %v1400_v26, %v1399_v47 }
 0x336   :  { %v1363_v25 = vpop.xlane.xlu0 %1362 }
 0x337   :  { %v1364_v41 = vrot.slane %v1363_v25, 4  ;;  %v1402_v20 = vrot.slane %v1401_v16, 1 }
 0x339   :  { %v1365_v40 = vadd.f32 %v1364_v41, %v1363_v25  ;;  %v1403_v9 = vadd.f32 %v1402_v20, %v1401_v16 }
 0x33b   :  { %v1366_v60 = vrot.slane %v1365_v40, 2 }
 0x33d   :  { %v1367_v48 = vadd.f32 %v1366_v60, %v1365_v40 }
 0x33f   :  { %v1368_v2 = vrot.slane %v1367_v48, 1 }
 0x341   :  { %v1369_v58 = vadd.f32 %v1368_v2, %v1367_v48 }
 0x343   :  { %1445 = vpush %v1369_v58 }
 0x344   :  { %1447 = vpush %v1383_v33 }
 0x345   :  { %1449 = vpush %v1403_v9 }
 0x374   :  { %s1446_s2 = spop %1445 }
 0x375   :  { %s1448_s26 = spop %1447  ;;  %v1420_v34 = vstv %s1446_s2 }
 0x376   :  { %v1418_v54 = vstv %s1448_s26  ;;  %s1450_s29 = spop %1449 }
 0x377   :  { %v1416_v39 = vstv %s1450_s29 }
 0x378   :  { %v1417_v30 = vsel %vm1415_vm11, %v1416_v39, 0.0 }
 0x379   :  { %v1419_v6 = vsel %vm1413_vm12, %v1418_v54, %v1417_v30 }
 0x37a   :  { %v1421_v46 = vsel %vm1411_vm13, %v1420_v34, %v1419_v6 }
 0x37b   :  { %1422 = vst [vmem:[#allocation8] sm:$0xff] %v1421_v46 }
 0x37c   :  { %1433 = dma.vmem_to_hbm [thread:$0]  %s1429_s28, 128, %s1431_s7, [#allocation4]  }
 0x37d   :  { %1569 = dma.done.wait [#allocation4], 128  }
 0x37e   :  { %1570 = vsyncadd [#allocation4], 4294967168 }
 0x37f   :  { %1438 = vsyncpa [#allocation3], 1 }
 0x380   :  { %1439 = vsyncpa [#allocation6], 1 }
 0x381   :  { %1440 = vsyncpa [#allocation4], 1 }

</bundles_post_ra>
